<compile_context>
chip_gen: v6e
topology: v6e:2x2x1
jax: 0.10.0
libtpu: 0.0.40
codegen_flags: <defaults>
</compile_context>

<pallas_src>
import functools

import jax
import jax.numpy as jnp
from jax.experimental import pallas as pl
from jax.experimental.pallas import tpu as pltpu


# ----------------------------- Pallas kernel --------------------------------


def _xnorpp_kernel(a_ref, w_ref, alpha_ref, o_ref, acc_ref):
    """Tiled matmul with per-output-channel scale.

    a_ref:     (TM, TK)  bf16 sign(patches) tile
    w_ref:     (TK, TN)  bf16 sign(weights) tile
    alpha_ref: (1,  TN)  f32 per-out-channel scale (zero in padded columns)
    o_ref:     (TM, TN)  f32 output tile
    acc_ref:   (TM, TN)  f32 VMEM accumulator (persists across the K axis)
    """
    @pl.when(pl.program_id(2) == 0)
    def _init():
        acc_ref[...] = jnp.zeros_like(acc_ref)

    acc_ref[...] += jnp.dot(a_ref[...], w_ref[...],
                            preferred_element_type=jnp.float32)

    @pl.when(pl.program_id(2) == pl.num_programs(2) - 1)
    def _finalize():
        o_ref[...] = (acc_ref[...] * alpha_ref[...]).astype(o_ref.dtype)


# ------------------------------ Host wrapper ---------------------------------


def _round_up(x, m):
    return (x + m - 1) // m * m


def _im2col_nchw(x, kh, kw):
    """x: (N, C, H, W) -> (N*OH*OW, C*KH*KW), stride 1, no padding (VALID).

    Feature ordering is (c, kh, kw) with c slowest, matching
    weight.reshape(OC, C*KH*KW).  XLA fuses this with the preceding sign/cast.
    """
    n, c, h, w = x.shape
    oh, ow = h - kh + 1, w - kw + 1
    cols = []
    for i in range(kh):
        for j in range(kw):
            cols.append(x[:, :, i:i + oh, j:j + ow])      # (N, C, OH, OW)
    patches = jnp.stack(cols, axis=2)                     # (N, C, KH*KW, OH, OW)
    patches = jnp.transpose(patches, (0, 3, 4, 1, 2))     # (N, OH, OW, C, KH*KW)
    return patches.reshape(n * oh * ow, c * kh * kw), (n, oh, ow)


@functools.partial(jax.jit, static_argnames=("tm", "tn", "tk"))
def conv2d_xnorpp(x, weight, alpha, *, tm=256, tn=128, tk=512):
    """Forward pass of Conv2d_XnorPP (stride=1, padding=0, dilation=1, groups=1).

    x:      (N, C, H, W)       float
    weight: (OC, C, KH, KW)    float
    alpha:  (OC, 1, 1)         float (per-out-channel scale)
    returns (N, OC, OH, OW)    float32
    """
    oc, c, kh, kw = weight.shape

    # Binarize + cast to bf16 BEFORE im2col: the 9x expansion then happens at
    # half the byte cost, and +/-1 is exactly representable in bf16.
    x_sign = jnp.where(x > 0, 1.0, -1.0).astype(jnp.bfloat16)
    a, (n, oh, ow) = _im2col_nchw(x_sign, kh, kw)         # (M, K) bf16
    m, k = a.shape

    # Tile sizes: clamp to the (lane-padded) problem, keep lane-dense multiples
    # of 128 everywhere so loads/stores are unmasked.
    tm = min(tm, _round_up(m, 128))
    tn = min(tn, _round_up(oc, 128))
    tk = min(tk, _round_up(k, 128))
    m_pad = _round_up(m, tm)
    k_pad = _round_up(k, tk)
    oc_pad = _round_up(oc, tn)

    # Zero-padding AFTER the sign is exact: padded K rows/cols contribute 0 to
    # every dot product; padded M rows / OC cols are garbage-free and sliced off.
    a_pad = jnp.pad(a, ((0, m_pad - m), (0, k_pad - k)))

    w_sign = jnp.where(weight > 0, 1.0, -1.0).astype(jnp.bfloat16)
    w_mat = w_sign.reshape(oc, c * kh * kw).T             # (K, OC) bf16
    w_pad = jnp.pad(w_mat, ((0, k_pad - k), (0, oc_pad - oc)))

    alpha_row = jnp.pad(alpha.reshape(1, oc).astype(jnp.float32),
                        ((0, 0), (0, oc_pad - oc)))       # (1, OC_pad)

    out = pl.pallas_call(
        _xnorpp_kernel,
        out_shape=jax.ShapeDtypeStruct((m_pad, oc_pad), jnp.float32),
        grid_spec=pltpu.PrefetchScalarGridSpec(
            num_scalar_prefetch=0,
            grid=(m_pad // tm, oc_pad // tn, k_pad // tk),
            in_specs=[
                pl.BlockSpec((tm, tk), lambda i, j, kk: (i, kk)),   # patches
                pl.BlockSpec((tk, tn), lambda i, j, kk: (kk, j)),   # weights
                pl.BlockSpec((1, tn), lambda i, j, kk: (0, j)),     # alpha
            ],
            out_specs=pl.BlockSpec((tm, tn), lambda i, j, kk: (i, j)),
            scratch_shapes=[pltpu.VMEM((tm, tn), jnp.float32)],
        ),
        compiler_params=pltpu.CompilerParams(
            dimension_semantics=("parallel", "parallel", "arbitrary")),
    )(a_pad, w_pad, alpha_row)

    out = out[:m, :oc]                                    # (M, OC)
    out = out.reshape(n, oh, ow, oc)
    return jnp.transpose(out, (0, 3, 1, 2))               # NCHW (module contract)


# ------------------------------ Reference ------------------------------------


def conv2d_xnorpp_ref(x, weight, alpha):
    xs = jnp.where(x > 0.0, 1.0, -1.0).astype(jnp.float32)
    ws = jnp.where(weight > 0.0, 1.0, -1.0).astype(jnp.float32)
    out = jax.lax.conv_general_dilated(
        xs, ws, window_strides=(1, 1), padding="VALID",
        dimension_numbers=("NCHW", "OIHW", "NCHW"))
    return out * alpha.reshape(1, -1, 1, 1)


# --------------------------------- Main ---------------------------------------


if __name__ == "__main__":
    # Module config: Conv2d_XnorPP(in_channels=4, out_channels=8, kernel_size=3,
    #                              bias=False)  (stride=1, padding=0 defaults)
    N, C, H, W = 2, 4, 16, 16
    OC, K = 8, 3

    key = jax.random.PRNGKey(0)
    kx, kw = jax.random.split(key)
    x = jax.random.normal(kx, (N, C, H, W), dtype=jnp.float32)
    # Exact init values are irrelevant to the binary forward — only signs matter.
    weight = jax.random.normal(kw, (OC, C, K, K), dtype=jnp.float32) * 0.1
    # alpha is initialized to ones in the module's __init__ (shape (OC, 1, 1)).
    alpha = jnp.ones((OC, 1, 1), dtype=jnp.float32)

    out = conv2d_xnorpp(x, weight, alpha)
    out = jax.block_until_ready(out)

    ref = conv2d_xnorpp_ref(x, weight, alpha)
    assert out.shape == (N, OC, H - K + 1, W - K + 1), out.shape
    assert jnp.allclose(out, ref, atol=1e-5, rtol=1e-5), "mismatch vs reference"

    print("KERNEL_OK")
</pallas_src>

<mosaic_0001>
module attributes {stable_mosaic.version = 11 : i64} {
  func.func @_xnorpp_kernel(%arg0: i32, %arg1: i32, %arg2: i32, %arg3: memref<256x128xbf16, #tpu.memory_space<vmem>>, %arg4: memref<128x128xbf16, #tpu.memory_space<vmem>>, %arg5: memref<1x128xf32, #tpu.memory_space<vmem>>, %arg6: memref<256x128xf32, #tpu.memory_space<vmem>>, %arg7: memref<256x128xf32, #tpu.memory_space<vmem>>) attributes {dimension_semantics = [#tpu.dimension_semantics<parallel>, #tpu.dimension_semantics<parallel>, #tpu.dimension_semantics<arbitrary>], iteration_bounds = array<i64: 2, 1, 1>, scalar_prefetch = 0 : i64, scratch_operands = 1 : i64, tpu.core_type = #tpu.core_type<tc>, window_params = [{transform_indices = @transform_0, window_bounds = array<i64: 256, 128>}, {transform_indices = @transform_1, window_bounds = array<i64: 128, 128>}, {transform_indices = @transform_2, window_bounds = array<i64: 1, 128>}, {transform_indices = @transform_3, window_bounds = array<i64: 256, 128>}]} {
    %c0_i32 = arith.constant 0 : i32
    %0 = arith.cmpi eq, %arg2, %c0_i32 : i32
    %1 = arith.extui %0 : i1 to i32
    %c0_i32_0 = arith.constant 0 : i32
    %2 = arith.cmpi ne, %1, %c0_i32_0 : i32
    scf.if %2 {
      %cst_10 = arith.constant 0.000000e+00 : f32
      %12 = vector.broadcast %cst_10 : f32 to vector<256x128xf32>
      %c0_11 = arith.constant 0 : index
      %c0_12 = arith.constant 0 : index
      %13 = vector.load %arg7[%c0_11, %c0_12] : memref<256x128xf32, #tpu.memory_space<vmem>>, vector<256x128xf32>
      tpu.vector_store %arg7[%c0_11, %c0_12], %12 {strides = array<i32>} : memref<256x128xf32, #tpu.memory_space<vmem>>, vector<256x128xf32>,
    } else {
    }
    %c0 = arith.constant 0 : index
    %c0_1 = arith.constant 0 : index
    %3 = vector.load %arg7[%c0, %c0_1] : memref<256x128xf32, #tpu.memory_space<vmem>>, vector<256x128xf32>
    %c0_2 = arith.constant 0 : index
    %c0_3 = arith.constant 0 : index
    %4 = vector.load %arg3[%c0_2, %c0_3] : memref<256x128xbf16, #tpu.memory_space<vmem>>, vector<256x128xbf16>
    %c0_4 = arith.constant 0 : index
    %c0_5 = arith.constant 0 : index
    %5 = vector.load %arg4[%c0_4, %c0_5] : memref<128x128xbf16, #tpu.memory_space<vmem>>, vector<128x128xbf16>
    %cst = arith.constant dense<0.000000e+00> : vector<256x128xf32>
    %6 = tpu.matmul %4, %5, %cst {dimension_numbers = #tpu.dot_dimension_numbers<[1], [0], [0], [1], [0, 0, 1, 1], [], []>} : vector<256x128xbf16>, vector<128x128xbf16>, vector<256x128xf32> -> vector<256x128xf32>
    %7 = arith.addf %3, %6 : vector<256x128xf32>
    %c0_6 = arith.constant 0 : index
    %c0_7 = arith.constant 0 : index
    %8 = vector.load %arg7[%c0_6, %c0_7] : memref<256x128xf32, #tpu.memory_space<vmem>>, vector<256x128xf32>
    tpu.vector_store %arg7[%c0_6, %c0_7], %7 {strides = array<i32>} : memref<256x128xf32, #tpu.memory_space<vmem>>, vector<256x128xf32>,
    %c0_i32_8 = arith.constant 0 : i32
    %9 = arith.cmpi eq, %arg2, %c0_i32_8 : i32
    %10 = arith.extui %9 : i1 to i32
    %c0_i32_9 = arith.constant 0 : i32
    %11 = arith.cmpi ne, %10, %c0_i32_9 : i32
    scf.if %11 {
      %c0_10 = arith.constant 0 : index
      %c0_11 = arith.constant 0 : index
      %12 = vector.load %arg7[%c0_10, %c0_11] : memref<256x128xf32, #tpu.memory_space<vmem>>, vector<256x128xf32>
      %c0_12 = arith.constant 0 : index
      %c0_13 = arith.constant 0 : index
      %13 = vector.load %arg5[%c0_12, %c0_13] : memref<1x128xf32, #tpu.memory_space<vmem>>, vector<1x128xf32>
      %14 = vector.broadcast %13 : vector<1x128xf32> to vector<256x128xf32>
      %15 = arith.mulf %12, %14 : vector<256x128xf32>
      %c0_14 = arith.constant 0 : index
      %c0_15 = arith.constant 0 : index
      %16 = vector.load %arg6[%c0_14, %c0_15] : memref<256x128xf32, #tpu.memory_space<vmem>>, vector<256x128xf32>
      tpu.vector_store %arg6[%c0_14, %c0_15], %15 {strides = array<i32>} : memref<256x128xf32, #tpu.memory_space<vmem>>, vector<256x128xf32>,
    } else {
    }
    return
  }
  func.func @transform_0(%arg0: i32, %arg1: i32, %arg2: i32) -> (i32, i32) {
    %c0_i32 = arith.constant 0 : i32
    return %arg0, %arg2 : i32, i32
  }
  func.func @transform_1(%arg0: i32, %arg1: i32, %arg2: i32) -> (i32, i32) {
    %c0_i32 = arith.constant 0 : i32
    return %arg2, %arg1 : i32, i32
  }
  func.func @transform_2(%arg0: i32, %arg1: i32, %arg2: i32) -> (i32, i32) {
    %c0_i32 = arith.constant 0 : i32
    %c0_i32_0 = arith.constant 0 : i32
    return %c0_i32, %arg1 : i32, i32
  }
  func.func @transform_3(%arg0: i32, %arg1: i32, %arg2: i32) -> (i32, i32) {
    %c0_i32 = arith.constant 0 : i32
    return %arg0, %arg1 : i32, i32
  }
}

</mosaic_0001>

<bundles_post_ra>
// kernel: conv2d_xnorpp.1
= control target key start
LH: loop header
LB: loop body
LE: loop exit
PB: predicated region body
PF: predicated region fallthrough
CT: control target
= control target key end

     0   :  { %s1180_s12 = smov 0   ;;  %s1182_s13 = smov 0   ;;  %s1330_s0 = inlined_call_operand.vmem [shape: bf16[512,128], index: 0, kind: input, shape index: {}]   ;;  %s1331_s1 = inlined_call_operand.vmem [shape: bf16[128,128], index: 1, kind: input, shape index: {}]   ;;  %s1332_s2 = inlined_call_operand.vmem [shape: f32[1,128], index: 2, kind: input, shape index: {}]   ;;  %s1333_s3 = inlined_call_operand.vmem [shape: f32[512,128], index: 3, kind: output, shape index: {}]  }
   0x1   :  { %s1184_s14 = smov 0  }
   0x2 LB: > { %s32_s15 = sadd.s32 1, %s1154_s13  ;;  %p968_p0 = scmp.ge.s32.totalorder %s1158_s14, 1  ;;  %s1158_s14 = sphi %s1184_s14, %s13_s14   ;;  %s1154_s13 = sphi %s1182_s13, %s1335_s13   ;;  %s1150_s12 = sphi %s1180_s12, %s1334_s12  }
   0x3   : > { %p34_p1 = scmp.ge.s32.totalorder %s32_s15, 2  ;;  %p188_p2 = scmp.lt.s32.totalorder %s1158_s14, 3 }
   0x5   : > { %s1337_s15 = smov (%p34_p1, %s32_s15), 0  ;;  %p189_p3 = pnand %p968_p0, %p188_p2 }
   0x6   : > { %s969_s18 = sshll.u32 (!%p189_p3), %s1150_s12, 5 }
   0x7   : > { %192 = sbr.rel (%p189_p3) target bundleno = 271 (0x10f), region = 32  ;;  %p230_p4 = scmp.lt.s32.totalorder (!%p189_p3), %s969_s18, 63 }
   0xc   : > { %v1112_v0 = vld [vmem:[%s1331_s1 + $0x38] sm:$0xff]   ;;  %v1113_v1 = vld [vmem:[%s1331_s1 + $0x30] sm:$0xff]   ;;  %s1339_s18 = smov (!%p230_p4, %s969_s18), 63  ;;  %v1114_v2 = vld [vmem:[%s1331_s1 + $0x28] sm:$0xff]  }
   0xd   : > { %1024 = vmatprep.subr.bf16.mxu0 %v1112_v0  ;;  %1072 = vmatprep.subr.bf16.mxu1 %v1112_v0  ;;  %s970_s23 = sshll.u32 %s1339_s18, 2  ;;  %v1115_v3 = vld [vmem:[%s1331_s1 + $0x20] sm:$0xff]   ;;  %v1116_v6 = vld [vmem:[%s1331_s1 + $0x18] sm:$0xff]   ;;  %v1117_v7 = vld [vmem:[%s1331_s1 + $0x10] sm:$0xff]   ;;  %s972_s10 = sshll.u32 %s1339_s18, 3 }
   0xe   : > { %1025 = vmatpush3.bf16.msra.mxu0 %v1112_v0  ;;  %1080 = vmatpush3.bf16.msra.mxu1 %v1112_v0  ;;  %s1213_s26 = scalar_lea.vmem %s1330_s0, %s970_s23  ;;  %v1118_v8 = vld [vmem:[%s1331_s1 + $0x8] sm:$0xff]   ;;  %v1119_v9 = vld [vmem:[%s1331_s1] sm:$0xff]   ;;  %s1255_s19 = scalar_lea.vmem %s1333_s3, %s972_s10 }
   0xf   : > { %1026 = vmatprep.subr.bf16.mxu0 %v1113_v1  ;;  %1073 = vmatprep.subr.bf16.mxu1 %v1113_v1  ;;  %v1120_v4 = vld [vmem:[%s1213_s26] sm:$0xff]   ;;  %v1122_v10 = vld [vmem:[%s1213_s26 + $0x8] sm:$0xff]   ;;  %v1124_v12 = vld [vmem:[%s1213_s26 + $0x10] sm:$0xff]  }
  0x10   : > { %v1121_v5 = vld [vmem:[%s1213_s26 + $0x40] sm:$0xff]   ;;  %1040 = vmatprep.mubr.bf16.mxu0 %v1120_v4  ;;  %v1123_v11 = vld [vmem:[%s1213_s26 + $0x48] sm:$0xff]   ;;  %v1125_v13 = vld [vmem:[%s1213_s26 + $0x50] sm:$0xff]  }
  0x11   : > { %1056 = vmatprep.mubr.bf16.mxu1 %v1121_v5  ;;  %v1126_v14 = vld [vmem:[%s1213_s26 + $0x18] sm:$0xff]   ;;  %v1128_v16 = vld [vmem:[%s1213_s26 + $0x20] sm:$0xff]   ;;  %v1130_v18 = vld [vmem:[%s1213_s26 + $0x28] sm:$0xff]  }
  0x12   : > { %1027 = vmatpush3.bf16.msra.mxu0 %v1113_v1  ;;  %1081 = vmatpush3.bf16.msra.mxu1 %v1113_v1  ;;  %v1127_v15 = vld [vmem:[%s1213_s26 + $0x58] sm:$0xff]   ;;  %v1129_v17 = vld [vmem:[%s1213_s26 + $0x60] sm:$0xff]   ;;  %v1131_v19 = vld [vmem:[%s1213_s26 + $0x68] sm:$0xff]  }
  0x13   : > { %1028 = vmatprep.subr.bf16.mxu0 %v1114_v2  ;;  %1074 = vmatprep.subr.bf16.mxu1 %v1114_v2  ;;  %v1132_v20 = vld [vmem:[%s1213_s26 + $0x30] sm:$0xff]   ;;  %v1134_v22 = vld [vmem:[%s1213_s26 + $0x38] sm:$0xff]   ;;  %v1250_v24 = vld [vmem:[%s1332_s2] ss:$0 sm:$0xff] }
  0x14   : > { %v1133_v21 = vld [vmem:[%s1213_s26 + $0x70] sm:$0xff]   ;;  %v1135_v23 = vld [vmem:[%s1213_s26 + $0x78] sm:$0xff]  }
  0x16   : > { %1029 = vmatpush3.bf16.msra.mxu0 %v1114_v2  ;;  %1082 = vmatpush3.bf16.msra.mxu1 %v1114_v2 }
  0x17   : > { %1030 = vmatprep.subr.bf16.mxu0 %v1115_v3  ;;  %1075 = vmatprep.subr.bf16.mxu1 %v1115_v3 }
  0x1a   : > { %1031 = vmatpush3.bf16.msra.mxu0 %v1115_v3  ;;  %1083 = vmatpush3.bf16.msra.mxu1 %v1115_v3 }
  0x1b   : > { %1032 = vmatprep.subr.bf16.mxu0 %v1116_v6  ;;  %1076 = vmatprep.subr.bf16.mxu1 %v1116_v6 }
  0x1e   : > { %1033 = vmatpush3.bf16.msra.mxu0 %v1116_v6  ;;  %1084 = vmatpush3.bf16.msra.mxu1 %v1116_v6 }
  0x1f   : > { %1034 = vmatprep.subr.bf16.mxu0 %v1117_v7  ;;  %1077 = vmatprep.subr.bf16.mxu1 %v1117_v7 }
  0x22   : > { %1035 = vmatpush3.bf16.msra.mxu0 %v1117_v7  ;;  %1085 = vmatpush3.bf16.msra.mxu1 %v1117_v7 }
  0x23   : > { %1036 = vmatprep.subr.bf16.mxu0 %v1118_v8  ;;  %1078 = vmatprep.subr.bf16.mxu1 %v1118_v8 }
  0x26   : > { %1037 = vmatpush3.bf16.msra.mxu0 %v1118_v8  ;;  %1086 = vmatpush3.bf16.msra.mxu1 %v1118_v8 }
  0x27   : > { %1038 = vmatprep.subr.bf16.mxu0 %v1119_v9  ;;  %1079 = vmatprep.subr.bf16.mxu1 %v1119_v9 }
  0x2a   : > { %1039 = vmatpush3.bf16.msra.mxu0 %v1119_v9  ;;  %1087 = vmatpush3.bf16.msra.mxu1 %v1119_v9 }
  0x2d   : > { %1041 = vmatmul.mubr.bf16.vlgmr.msra.gmra.mxu0 %v1122_v10  ;;  %1057 = vmatmul.mubr.bf16.vlgmr.msra.gmra.mxu1 %v1123_v11 }
  0x2e   : > { %1044 = vmatprep.mubr.bf16.mxu0 %v1124_v12  ;;  %1060 = vmatprep.mubr.bf16.mxu1 %v1125_v13 }
  0x35   : > { %1045 = vmatmul.mubr.bf16.gmra.mxu0 %v1126_v14  ;;  %1061 = vmatmul.mubr.bf16.gmra.mxu1 %v1127_v15 }
  0x36   : > { %1048 = vmatprep.mubr.bf16.mxu0 %v1128_v16  ;;  %1064 = vmatprep.mubr.bf16.mxu1 %v1129_v17 }
  0x3d   : > { %1049 = vmatmul.mubr.bf16.gmra.mxu0 %v1130_v18  ;;  %1065 = vmatmul.mubr.bf16.gmra.mxu1 %v1131_v19 }
  0x3e   : > { %1052 = vmatprep.mubr.bf16.mxu0 %v1132_v20  ;;  %1068 = vmatprep.mubr.bf16.mxu1 %v1133_v21 }
  0x45   : > { %1053 = vmatmul.mubr.bf16.gmra.mxu0 %v1134_v22  ;;  %1069 = vmatmul.mubr.bf16.gmra.mxu1 %v1135_v23 }
  0xed   : > { %v1042_v25 = vpop.f32.mrf.mxu0  ;;  %v1058_v26 = vpop.f32.mrf.mxu1 }
  0xee   : > { %v789_v27 = vmul.f32 %v1042_v25, %v1250_v24  ;;  %v805_v28 = vmul.f32 %v1058_v26, %v1250_v24 }
  0xef   : > { %v554_v29 = vpop.f32.mrf.mxu0  ;;  %v618_v30 = vpop.f32.mrf.mxu1 }
  0xf0   : > { %821 = vst [vmem:[%s1255_s19 + $0x10] sm:$0xff] %v789_v27  ;;  %837 = vst [vmem:[%s1255_s19 + $0x90] sm:$0xff] %v805_v28  ;;  %v787_v31 = vmul.f32 %v1250_v24, %v554_v29  ;;  %v803_v32 = vmul.f32 %v1250_v24, %v618_v30 }
  0xf1   : > { %v1043_v33 = vpop.f32.mrf.mxu0  ;;  %v1059_v34 = vpop.f32.mrf.mxu1 }
  0xf2   : > { %819 = vst [vmem:[%s1255_s19] sm:$0xff] %v787_v31  ;;  %835 = vst [vmem:[%s1255_s19 + $0x80] sm:$0xff] %v803_v32  ;;  %v790_v35 = vmul.f32 %v1043_v33, %v1250_v24  ;;  %v806_v36 = vmul.f32 %v1059_v34, %v1250_v24 }
  0xf3   : > { %v557_v37 = vpop.f32.mrf.mxu0  ;;  %v621_v38 = vpop.f32.mrf.mxu1 }
  0xf4   : > { %822 = vst [vmem:[%s1255_s19 + $0x18] sm:$0xff] %v790_v35  ;;  %838 = vst [vmem:[%s1255_s19 + $0x98] sm:$0xff] %v806_v36  ;;  %v788_v39 = vmul.f32 %v1250_v24, %v557_v37  ;;  %v804_v40 = vmul.f32 %v1250_v24, %v621_v38 }
  0xf5   : > { %v1046_v41 = vpop.f32.mrf.mxu0  ;;  %v1062_v42 = vpop.f32.mrf.mxu1 }
  0xf6   : > { %820 = vst [vmem:[%s1255_s19 + $0x8] sm:$0xff] %v788_v39  ;;  %836 = vst [vmem:[%s1255_s19 + $0x88] sm:$0xff] %v804_v40  ;;  %v793_v43 = vmul.f32 %v1046_v41, %v1250_v24  ;;  %v809_v44 = vmul.f32 %v1062_v42, %v1250_v24 }
  0xf7   : > { %v570_v45 = vpop.f32.mrf.mxu0  ;;  %v634_v46 = vpop.f32.mrf.mxu1 }
  0xf8   : > { %825 = vst [vmem:[%s1255_s19 + $0x30] sm:$0xff] %v793_v43  ;;  %841 = vst [vmem:[%s1255_s19 + $0xb0] sm:$0xff] %v809_v44  ;;  %v791_v47 = vmul.f32 %v1250_v24, %v570_v45  ;;  %v807_v48 = vmul.f32 %v1250_v24, %v634_v46 }
  0xf9   : > { %v1047_v49 = vpop.f32.mrf.mxu0  ;;  %v1063_v50 = vpop.f32.mrf.mxu1 }
  0xfa   : > { %823 = vst [vmem:[%s1255_s19 + $0x20] sm:$0xff] %v791_v47  ;;  %839 = vst [vmem:[%s1255_s19 + $0xa0] sm:$0xff] %v807_v48  ;;  %v794_v51 = vmul.f32 %v1047_v49, %v1250_v24  ;;  %v810_v52 = vmul.f32 %v1063_v50, %v1250_v24 }
  0xfb   : > { %v573_v53 = vpop.f32.mrf.mxu0  ;;  %v637_v54 = vpop.f32.mrf.mxu1 }
  0xfc   : > { %826 = vst [vmem:[%s1255_s19 + $0x38] sm:$0xff] %v794_v51  ;;  %842 = vst [vmem:[%s1255_s19 + $0xb8] sm:$0xff] %v810_v52  ;;  %v792_v55 = vmul.f32 %v1250_v24, %v573_v53  ;;  %v808_v56 = vmul.f32 %v1250_v24, %v637_v54 }
  0xfd   : > { %v1050_v57 = vpop.f32.mrf.mxu0  ;;  %v1066_v58 = vpop.f32.mrf.mxu1 }
  0xfe   : > { %824 = vst [vmem:[%s1255_s19 + $0x28] sm:$0xff] %v792_v55  ;;  %840 = vst [vmem:[%s1255_s19 + $0xa8] sm:$0xff] %v808_v56  ;;  %v797_v59 = vmul.f32 %v1050_v57, %v1250_v24  ;;  %v813_v60 = vmul.f32 %v1066_v58, %v1250_v24 }
  0xff   : > { %v586_v61 = vpop.f32.mrf.mxu0  ;;  %v650_v62 = vpop.f32.mrf.mxu1 }
 0x100   : > { %829 = vst [vmem:[%s1255_s19 + $0x50] sm:$0xff] %v797_v59  ;;  %845 = vst [vmem:[%s1255_s19 + $0xd0] sm:$0xff] %v813_v60  ;;  %v795_v63 = vmul.f32 %v1250_v24, %v586_v61  ;;  %v811_v0 = vmul.f32 %v1250_v24, %v650_v62 }
 0x101   : > { %v1051_v1 = vpop.f32.mrf.mxu0  ;;  %v1067_v2 = vpop.f32.mrf.mxu1 }
 0x102   : > { %827 = vst [vmem:[%s1255_s19 + $0x40] sm:$0xff] %v795_v63  ;;  %843 = vst [vmem:[%s1255_s19 + $0xc0] sm:$0xff] %v811_v0  ;;  %v798_v3 = vmul.f32 %v1051_v1, %v1250_v24  ;;  %v814_v4 = vmul.f32 %v1067_v2, %v1250_v24 }
 0x103   : > { %v589_v5 = vpop.f32.mrf.mxu0  ;;  %v653_v6 = vpop.f32.mrf.mxu1 }
 0x104   : > { %830 = vst [vmem:[%s1255_s19 + $0x58] sm:$0xff] %v798_v3  ;;  %846 = vst [vmem:[%s1255_s19 + $0xd8] sm:$0xff] %v814_v4  ;;  %v796_v7 = vmul.f32 %v1250_v24, %v589_v5  ;;  %v812_v8 = vmul.f32 %v1250_v24, %v653_v6 }
 0x105   : > { %v1054_v9 = vpop.f32.mrf.mxu0  ;;  %v1070_v10 = vpop.f32.mrf.mxu1 }
 0x106   : > { %828 = vst [vmem:[%s1255_s19 + $0x48] sm:$0xff] %v796_v7  ;;  %844 = vst [vmem:[%s1255_s19 + $0xc8] sm:$0xff] %v812_v8  ;;  %v801_v11 = vmul.f32 %v1054_v9, %v1250_v24  ;;  %v817_v12 = vmul.f32 %v1070_v10, %v1250_v24 }
 0x107   : > { %v602_v13 = vpop.f32.mrf.mxu0  ;;  %v666_v14 = vpop.f32.mrf.mxu1 }
 0x108   : > { %833 = vst [vmem:[%s1255_s19 + $0x70] sm:$0xff] %v801_v11  ;;  %849 = vst [vmem:[%s1255_s19 + $0xf0] sm:$0xff] %v817_v12  ;;  %v799_v15 = vmul.f32 %v1250_v24, %v602_v13  ;;  %v815_v16 = vmul.f32 %v1250_v24, %v666_v14 }
 0x109   : > { %v1055_v17 = vpop.f32.mrf.mxu0  ;;  %v1071_v18 = vpop.f32.mrf.mxu1 }
 0x10a   : > { %831 = vst [vmem:[%s1255_s19 + $0x60] sm:$0xff] %v799_v15  ;;  %847 = vst [vmem:[%s1255_s19 + $0xe0] sm:$0xff] %v815_v16  ;;  %v802_v19 = vmul.f32 %v1055_v17, %v1250_v24  ;;  %v818_v20 = vmul.f32 %v1071_v18, %v1250_v24 }
 0x10b   : > { %v605_v21 = vpop.f32.mrf.mxu0  ;;  %v669_v22 = vpop.f32.mrf.mxu1 }
 0x10c   : > { %834 = vst [vmem:[%s1255_s19 + $0x78] sm:$0xff] %v802_v19  ;;  %850 = vst [vmem:[%s1255_s19 + $0xf8] sm:$0xff] %v818_v20  ;;  %v800_v23 = vmul.f32 %v1250_v24, %v605_v21  ;;  %v816_v25 = vmul.f32 %v1250_v24, %v669_v22 }
 0x10e   : > { %832 = vst [vmem:[%s1255_s19 + $0x68] sm:$0xff] %v800_v23  ;;  %848 = vst [vmem:[%s1255_s19 + $0xe8] sm:$0xff] %v816_v25 }
 0x10f PF: > { %s13_s14 = sadd.s32 1, %s1158_s14   ;;  %s1334_s12 = smov %s1154_s13 }
 0x110   : > { %p10_p5 = scmp.ge.s32.totalorder %s13_s14, 4   ;;  %s1335_s13 = smov %s1337_s15 }
 0x112   :  { %12 = sbr.rel (!%p10_p5) target bundleno = 2 (0x2), region = 76 }

</bundles_post_ra>
